<compile_context>
chip_gen: v6e
topology: v6e:2x2x1
jax: 0.10.0
libtpu: 0.0.40
codegen_flags: <defaults>
</compile_context>

<pallas_src>
import functools

import jax
import jax.numpy as jnp
from jax import lax
from jax.experimental import pallas as pl
from jax.experimental.pallas import tpu as pltpu


def _round_up(x, m):
    return ((x + m - 1) // m) * m


def masked_linear_kernel(x_ref, w_ref, m_ref, b_ref, o_ref, acc_ref, *,
                         compute_dtype):
    k = pl.program_id(2)

    @pl.when(k == 0)
    def _init():
        acc_ref[...] = jnp.zeros_like(acc_ref)

    cd = compute_dtype if compute_dtype is not None else x_ref.dtype
    # Cast first, then mask: one VPU pass over the (tn, tk) tile in the narrow
    # compute dtype (no extra full-tile f32 multiply).  A 0/1 mask of any dtype
    # (incl. int8) stays exact under the cast.
    x_tile = x_ref[...].astype(cd)
    masked_w = w_ref[...].astype(cd) * m_ref[...].astype(cd)

    # x:[tm, tk] contracted with masked_w:[tn, tk] along tk -> [tm, tn].
    # The MXU consumes the transposed RHS natively; accumulate in f32.
    acc_ref[...] += lax.dot_general(
        x_tile, masked_w,
        dimension_numbers=(((1,), (1,)), ((), ())),
        preferred_element_type=jnp.float32)

    @pl.when(k == pl.num_programs(2) - 1)
    def _finalize():
        o_ref[...] = (acc_ref[...] + b_ref[...].astype(jnp.float32)).astype(
            o_ref.dtype)


def masked_linear(x, weight, mask, bias, *, tm=512, tn=512, tk=512,
                  compute_dtype=jnp.bfloat16, stream_compute_dtype=True):
    """x: [M, K], weight/mask: [N, K], bias: [N] -> [M, N]  (F.linear semantics).

    compute_dtype: MXU operand dtype (f32 accumulation always kept).  bf16 is
      the native MXU dtype on v5e/v6e/v7x; pass None for an exact f32 path.
    mask: pass as int8/bool to cut HBM/VMEM bytes (0/1 values are exact); a
      float mask (the module's Parameter default) also works.
    """
    M, K = x.shape
    N, K2 = weight.shape
    assert K2 == K and mask.shape == weight.shape and bias.shape == (N,)
    out_dtype = x.dtype

    # Stream x/weight in the compute dtype: halves the dominant per-step DMA
    # bytes; numerically identical to casting the f32 tiles inside the kernel.
    # TODO(synk): for a mask that is static across steps, pre-fuse
    # (weight*mask).astype(bf16) once outside the step to drop the mask stream.
    if compute_dtype is not None and stream_compute_dtype:
        x = x.astype(compute_dtype)
        weight = weight.astype(compute_dtype)

    # Clamp tiles to the hardware-aligned problem size.  tm: multiple of 16
    # (covers f32 and bf16 sublane tiling); tn/tk: multiples of 128 (the 512
    # defaults are 256-multiples, keeping the v6e/v7x 256x256 MXU full).
    tm = min(_round_up(tm, 16), _round_up(M, 16))
    tn = min(_round_up(tn, 128), _round_up(N, 128))
    tk = min(_round_up(tk, 128), _round_up(K, 128))

    # v7x has 2 TensorCores: if the (i, j) grid collapses to one tile, split N
    # so both cores get work (tn stays a multiple of 256).
    if (-(-M // tm)) * (-(-N // tn)) == 1 and tn >= 512:
        tn //= 2

    # Zero-pad so every block divides evenly (zeros are inert for dot and bias).
    Mp, Np, Kp = _round_up(M, tm), _round_up(N, tn), _round_up(K, tk)
    if (Mp, Kp) != (M, K):
        x = jnp.pad(x, ((0, Mp - M), (0, Kp - K)))
    if (Np, Kp) != (N, K):
        weight = jnp.pad(weight, ((0, Np - N), (0, Kp - K)))
        mask = jnp.pad(mask, ((0, Np - N), (0, Kp - K)))
    bias2d = (jnp.pad(bias, (0, Np - N)) if Np != N else bias).reshape(1, Np)

    grid = (Mp // tm, Np // tn, Kp // tk)

    # VMEM budget: double-buffered input/output tiles + f32 accumulator, with
    # 1.5x headroom, capped at 48 MiB (leaves Mosaic scratch room on v7x).
    isz = lambda a: jnp.dtype(a.dtype).itemsize
    need = (2 * tm * tk * isz(x) + 2 * tn * tk * isz(weight)
            + 2 * tn * tk * isz(mask) + 2 * tn * isz(bias2d)
            + 2 * tm * tn * jnp.dtype(out_dtype).itemsize + tm * tn * 4)
    vmem_limit = int(min(max(need * 3 // 2, 16 * 1024 * 1024),
                         48 * 1024 * 1024))

    kernel = functools.partial(masked_linear_kernel, compute_dtype=compute_dtype)

    out = pl.pallas_call(
        kernel,
        out_shape=jax.ShapeDtypeStruct((Mp, Np), out_dtype),
        grid_spec=pltpu.PrefetchScalarGridSpec(
            num_scalar_prefetch=0,
            grid=grid,
            in_specs=[
                pl.BlockSpec((tm, tk), lambda i, j, k: (i, k)),   # x tile
                pl.BlockSpec((tn, tk), lambda i, j, k: (j, k)),   # weight tile
                pl.BlockSpec((tn, tk), lambda i, j, k: (j, k)),   # mask tile
                pl.BlockSpec((1, tn), lambda i, j, k: (0, j)),    # bias tile
            ],
            out_specs=pl.BlockSpec((tm, tn), lambda i, j, k: (i, j)),
            scratch_shapes=[pltpu.VMEM((tm, tn), jnp.float32)],
        ),
        compiler_params=pltpu.CompilerParams(
            dimension_semantics=("parallel", "parallel", "arbitrary"),
            vmem_limit_bytes=vmem_limit,
        ),
    )(x, weight, mask, bias2d)

    if (Mp, Np) != (M, N):
        out = out[:M, :N]
    return out


if __name__ == "__main__":
    key = jax.random.PRNGKey(0)
    kx, kw, kb, km, kx2, kw2, kb2, km2 = jax.random.split(key, 8)

    # --- Run 1: 256-sized problem, bf16 compute path, int8 mask. ---
    M, K, N = 256, 256, 256
    x = jax.random.normal(kx, (M, K), dtype=jnp.float32)
    weight = jax.random.normal(kw, (N, K), dtype=jnp.float32) * 0.1
    bias = jax.random.normal(kb, (N,), dtype=jnp.float32) * 0.1
    # 0/1 mask stored as int8: 4x fewer HBM/VMEM bytes than f32, exact values.
    mask = (jax.random.uniform(km, (N, K)) > 0.5).astype(jnp.int8)

    out = masked_linear(x, weight, mask, bias)  # defaults: bf16 compute
    out = jax.block_until_ready(out)
    ref = x @ (weight * mask.astype(jnp.float32)).T + bias
    assert out.shape == (M, N)
    # bf16 operands (f32 accumulation) -> loose tolerance vs f32 reference.
    assert jnp.allclose(out, ref, atol=5e-2, rtol=5e-2)

    # --- Run 2: module-sized small check (batch=8, in=32, out=64) on the exact
    #     f32 path; exercises tile clamping / zero padding and a float mask. ---
    m2, k2, n2 = 8, 32, 64
    x2 = jax.random.normal(kx2, (m2, k2), dtype=jnp.float32)
    w2 = jax.random.normal(kw2, (n2, k2), dtype=jnp.float32) * 0.1
    b2 = jax.random.normal(kb2, (n2,), dtype=jnp.float32) * 0.1
    msk2 = (jax.random.uniform(km2, (n2, k2)) > 0.5).astype(jnp.float32)

    out2 = masked_linear(x2, w2, msk2, b2, compute_dtype=None)
    out2 = jax.block_until_ready(out2)
    ref2 = x2 @ (w2 * msk2).T + b2
    assert out2.shape == (m2, n2)
    assert jnp.allclose(out2, ref2, atol=1e-4, rtol=1e-4)

    print("KERNEL_OK")
</pallas_src>

<mosaic_0001>
module attributes {stable_mosaic.version = 11 : i64} {
  func.func @masked_linear_kernel(%arg0: i32, %arg1: i32, %arg2: i32, %arg3: memref<256x256xbf16, #tpu.memory_space<vmem>>, %arg4: memref<256x256xbf16, #tpu.memory_space<vmem>>, %arg5: memref<256x256xi8, #tpu.memory_space<vmem>>, %arg6: memref<1x256xf32, #tpu.memory_space<vmem>>, %arg7: memref<256x256xf32, #tpu.memory_space<vmem>>, %arg8: memref<256x256xf32, #tpu.memory_space<vmem>>) attributes {dimension_semantics = [#tpu.dimension_semantics<parallel>, #tpu.dimension_semantics<parallel>, #tpu.dimension_semantics<arbitrary>], iteration_bounds = array<i64: 1, 1, 1>, scalar_prefetch = 0 : i64, scratch_operands = 1 : i64, tpu.core_type = #tpu.core_type<tc>, window_params = [{transform_indices = @transform_0, window_bounds = array<i64: 256, 256>}, {transform_indices = @transform_1, window_bounds = array<i64: 256, 256>}, {transform_indices = @transform_2, window_bounds = array<i64: 256, 256>}, {transform_indices = @transform_3, window_bounds = array<i64: 1, 256>}, {transform_indices = @transform_4, window_bounds = array<i64: 256, 256>}]} {
    %c0_i32 = arith.constant 0 : i32
    %0 = arith.cmpi eq, %arg2, %c0_i32 : i32
    %1 = arith.extui %0 : i1 to i32
    %c0_i32_0 = arith.constant 0 : i32
    %2 = arith.cmpi ne, %1, %c0_i32_0 : i32
    scf.if %2 {
      %cst_12 = arith.constant 0.000000e+00 : f32
      %15 = vector.broadcast %cst_12 : f32 to vector<256x256xf32>
      %c0_13 = arith.constant 0 : index
      %c0_14 = arith.constant 0 : index
      %16 = vector.load %arg8[%c0_13, %c0_14] : memref<256x256xf32, #tpu.memory_space<vmem>>, vector<256x256xf32>
      tpu.vector_store %arg8[%c0_13, %c0_14], %15 {strides = array<i32>} : memref<256x256xf32, #tpu.memory_space<vmem>>, vector<256x256xf32>,
    } else {
    }
    %c0 = arith.constant 0 : index
    %c0_1 = arith.constant 0 : index
    %3 = vector.load %arg3[%c0, %c0_1] : memref<256x256xbf16, #tpu.memory_space<vmem>>, vector<256x256xbf16>
    %c0_2 = arith.constant 0 : index
    %c0_3 = arith.constant 0 : index
    %4 = vector.load %arg4[%c0_2, %c0_3] : memref<256x256xbf16, #tpu.memory_space<vmem>>, vector<256x256xbf16>
    %c0_4 = arith.constant 0 : index
    %c0_5 = arith.constant 0 : index
    %5 = vector.load %arg5[%c0_4, %c0_5] : memref<256x256xi8, #tpu.memory_space<vmem>>, vector<256x256xi8>
    %6 = arith.sitofp %5 : vector<256x256xi8> to vector<256x256xbf16>
    %7 = arith.mulf %4, %6 : vector<256x256xbf16>
    %c0_6 = arith.constant 0 : index
    %c0_7 = arith.constant 0 : index
    %8 = vector.load %arg8[%c0_6, %c0_7] : memref<256x256xf32, #tpu.memory_space<vmem>>, vector<256x256xf32>
    %cst = arith.constant dense<0.000000e+00> : vector<256x256xf32>
    %9 = tpu.matmul %3, %7, %cst {dimension_numbers = #tpu.dot_dimension_numbers<[1], [1], [0], [0], [0, 0, 1, 0], [], []>} : vector<256x256xbf16>, vector<256x256xbf16>, vector<256x256xf32> -> vector<256x256xf32>
    %10 = arith.addf %8, %9 : vector<256x256xf32>
    %c0_8 = arith.constant 0 : index
    %c0_9 = arith.constant 0 : index
    %11 = vector.load %arg8[%c0_8, %c0_9] : memref<256x256xf32, #tpu.memory_space<vmem>>, vector<256x256xf32>
    tpu.vector_store %arg8[%c0_8, %c0_9], %10 {strides = array<i32>} : memref<256x256xf32, #tpu.memory_space<vmem>>, vector<256x256xf32>,
    %c0_i32_10 = arith.constant 0 : i32
    %12 = arith.cmpi eq, %arg2, %c0_i32_10 : i32
    %13 = arith.extui %12 : i1 to i32
    %c0_i32_11 = arith.constant 0 : i32
    %14 = arith.cmpi ne, %13, %c0_i32_11 : i32
    scf.if %14 {
      %c0_12 = arith.constant 0 : index
      %c0_13 = arith.constant 0 : index
      %15 = vector.load %arg8[%c0_12, %c0_13] : memref<256x256xf32, #tpu.memory_space<vmem>>, vector<256x256xf32>
      %c0_14 = arith.constant 0 : index
      %c0_15 = arith.constant 0 : index
      %16 = vector.load %arg6[%c0_14, %c0_15] : memref<1x256xf32, #tpu.memory_space<vmem>>, vector<1x256xf32>
      %17 = vector.broadcast %16 : vector<1x256xf32> to vector<256x256xf32>
      %18 = arith.addf %15, %17 : vector<256x256xf32>
      %c0_16 = arith.constant 0 : index
      %c0_17 = arith.constant 0 : index
      %19 = vector.load %arg7[%c0_16, %c0_17] : memref<256x256xf32, #tpu.memory_space<vmem>>, vector<256x256xf32>
      tpu.vector_store %arg7[%c0_16, %c0_17], %18 {strides = array<i32>} : memref<256x256xf32, #tpu.memory_space<vmem>>, vector<256x256xf32>,
    } else {
    }
    return
  }
  func.func @transform_0(%arg0: i32, %arg1: i32, %arg2: i32) -> (i32, i32) {
    %c0_i32 = arith.constant 0 : i32
    return %arg0, %arg2 : i32, i32
  }
  func.func @transform_1(%arg0: i32, %arg1: i32, %arg2: i32) -> (i32, i32) {
    %c0_i32 = arith.constant 0 : i32
    return %arg1, %arg2 : i32, i32
  }
  func.func @transform_2(%arg0: i32, %arg1: i32, %arg2: i32) -> (i32, i32) {
    %c0_i32 = arith.constant 0 : i32
    return %arg1, %arg2 : i32, i32
  }
  func.func @transform_3(%arg0: i32, %arg1: i32, %arg2: i32) -> (i32, i32) {
    %c0_i32 = arith.constant 0 : i32
    %c0_i32_0 = arith.constant 0 : i32
    return %c0_i32, %arg1 : i32, i32
  }
  func.func @transform_4(%arg0: i32, %arg1: i32, %arg2: i32) -> (i32, i32) {
    %c0_i32 = arith.constant 0 : i32
    return %arg0, %arg1 : i32, i32
  }
}

</mosaic_0001>

<bundles_post_ra>
// kernel: tpu_custom_call.1
= control target key start
LH: loop header
LB: loop body
LE: loop exit
PB: predicated region body
PF: predicated region fallthrough
CT: control target
= control target key end

     0   :  { %9 = vsyncpa [#allocation4], 0  ;;  %s1753_s0 = inlined_call_operand.hbm [shape: bf16[256,256], index: 0, kind: input, shape index: {}]   ;;  %s1754_s1 = inlined_call_operand.hbm [shape: bf16[256,256], index: 1, kind: input, shape index: {}]   ;;  %s1755_s2 = inlined_call_operand.hbm [shape: s8[256,256], index: 2, kind: input, shape index: {}]   ;;  %s1756_s3 = inlined_call_operand.vmem [shape: f32[1,256], index: 3, kind: input, shape index: {}]   ;;  %s1757_s4 = inlined_call_operand.hbm [shape: f32[256,256], index: 4, kind: output, shape index: {}]  }
   0x1   :  { %10 = vsyncpa [#allocation7], 0 }
   0x2   :  { %11 = vsyncpa [#allocation5], 0  ;;  %s1631_s15 = smov [#allocation6]   ;;  %s1632_s17 = smov [#allocation3]  }
   0x3   :  { %s29_s16 = sshll.u32 %s1631_s15, 4  ;;  %s17_s18 = sshll.u32 %s1632_s17, 4  ;;  %s30_s16 = int_to_ptr.vmem [resolvable:$true] %s29_s16  ;;  %s18_s18 = int_to_ptr.vmem [resolvable:$true] %s17_s18 }
   0x4   :  { %s1553_s19 = scalar_lea.vmem %s30_s16, 4096  ;;  %p1558_p1 = scmp.lt.s32.totalorder %s30_s16, %s30_s16 }
   0x5   :  { %p1554_p0 = scmp.ne.s32.totalorder %s30_s16, %s1553_s19  ;;  %p1559_p2 = scmp.lt.s32.totalorder %s1553_s19, %s1553_s19 }
   0x7   :  { %p1560_p3 = por %p1559_p2, %p1558_p1 }
   0x9   :  { %p1561_p4 = pnand %p1560_p3, %p1554_p0 }
   0xb   :  { %1564 = shalt.err (!%p1561_p4)
}
   0xc   :  { %s1633_s20 = smov 128   ;;  %s1634_s21 = smov 8  }
   0xd   :  { %35 = dma.hbm_to_vmem [thread:$0]  %s1754_s1, 4096, %s30_s16, [#allocation7], %s1633_s20, %s1633_s20, %s1634_s21  }
   0xe   :  { %s1573_s24 = scalar_lea.vmem %s18_s18, 4096  ;;  %p1578_p6 = scmp.lt.s32.totalorder %s18_s18, %s18_s18 }
   0xf   :  { %p1574_p5 = scmp.ne.s32.totalorder %s18_s18, %s1573_s24  ;;  %p1579_p7 = scmp.lt.s32.totalorder %s1573_s24, %s1573_s24 }
  0x11   :  { %p1580_p8 = por %p1579_p7, %p1578_p6 }
  0x13   :  { %p1581_p9 = pnand %p1580_p8, %p1574_p5 }
  0x15   :  { %1584 = shalt.err (!%p1581_p9)
}
  0x16   :  { %23 = dma.hbm_to_vmem [thread:$0]  %s1753_s0, 4096, %s18_s18, [#allocation4], %s1633_s20, %s1633_s20, %s1634_s21  }
  0x17   :  { %s1635_s27 = smov [#allocation8]  }
  0x18   :  { %s41_s28 = sshll.u32 %s1635_s27, 4  ;;  %s42_s28 = int_to_ptr.vmem [resolvable:$true] %s41_s28 }
  0x19   :  { %s1593_s29 = scalar_lea.vmem %s42_s28, 2048  ;;  %p1598_p11 = scmp.lt.s32.totalorder %s42_s28, %s42_s28 }
  0x1a   :  { %p1594_p10 = scmp.ne.s32.totalorder %s42_s28, %s1593_s29  ;;  %p1599_p12 = scmp.lt.s32.totalorder %s1593_s29, %s1593_s29 }
  0x1c   :  { %p1600_p13 = por %p1599_p12, %p1598_p11 }
  0x1e   :  { %p1601_p0 = pnand %p1600_p13, %p1594_p10 }
  0x20   :  { %1604 = shalt.err (!%p1601_p0)
}
  0x21   :  { %s1636_s1 = smov 256   ;;  %s1637_s30 = smov 16  }
  0x22   :  { %47 = dma.hbm_to_vmem [thread:$0]  %s1755_s2, 2048, %s42_s28, [#allocation7], %s1636_s1, %s1636_s1, %s1637_s30  }
  0x23   :  { %1625 = dma.done.wait [#allocation4], 4096  }
  0x24   :  { %1626 = vsyncadd [#allocation4], 4294963200 }
  0x25   :  { %1627 = dma.done.wait [#allocation7], 6144  }
  0x26   :  { %1628 = vsyncadd [#allocation7], 4294961152  ;;  %v197_v0 = vld [vmem:[#allocation8 + $0x30] sm:$0xff]  ;;  %v198_v1 = vld [vmem:[#allocation8 + $0x38] sm:$0xff] }
  0x27   :  { %v219_v2 = vunpack.c.l.s8.bf16 %v197_v0  ;;  %v221_v3 = vunpack.c.h.s8.bf16 %v197_v0  ;;  %v173_v4 = vld [vmem:[#allocation6 + $0x70] sm:$0xff]  ;;  %v174_v5 = vld [vmem:[#allocation6 + $0x78] sm:$0xff]  ;;  %v220_v6 = vunpack.c.l.s8.bf16 %v198_v1  ;;  %v222_v7 = vunpack.c.h.s8.bf16 %v198_v1  ;;  %v195_v8 = vld [vmem:[#allocation8 + $0x20] sm:$0xff] }
  0x28   :  { %v171_v9 = vld [vmem:[#allocation6 + $0x60] sm:$0xff]  ;;  %v172_v10 = vld [vmem:[#allocation6 + $0x68] sm:$0xff]  ;;  %v217_v12 = vunpack.c.h.s8.bf16 %v195_v8  ;;  %v169_v27 = vld [vmem:[#allocation6 + $0x50] sm:$0xff]  ;;  %v215_v31 = vunpack.c.l.s8.bf16 %v195_v8 }
  0x29   :  { %v196_v11 = vld [vmem:[#allocation8 + $0x28] sm:$0xff]  ;;  %v1375_v13 = vcombine.low %v221_v3, %v222_v7  ;;  %v1376_v14 = vcombine.high %v221_v3, %v222_v7  ;;  %v1373_v15 = vcombine.low %v219_v2, %v220_v6  ;;  %v1374_v16 = vcombine.high %v219_v2, %v220_v6  ;;  %v170_v28 = vld [vmem:[#allocation6 + $0x58] sm:$0xff]  ;;  %v167_v34 = vld [vmem:[#allocation6 + $0x40] sm:$0xff] }
  0x2a   :  { %v218_v17 = vunpack.c.h.s8.bf16 %v196_v11  ;;  %v216_v32 = vunpack.c.l.s8.bf16 %v196_v11  ;;  %v168_v35 = vld [vmem:[#allocation6 + $0x48] sm:$0xff]  ;;  %v193_v36 = vld [vmem:[#allocation8 + $0x10] sm:$0xff]  ;;  %v194_v40 = vld [vmem:[#allocation8 + $0x18] sm:$0xff] }
  0x2b   :  { %v413_v18 = vmul.bf16 %v1375_v13, %v173_v4  ;;  %v414_v19 = vmul.bf16 %v1376_v14, %v174_v5  ;;  %v411_v20 = vmul.bf16 %v1373_v15, %v171_v9  ;;  %v412_v21 = vmul.bf16 %v1374_v16, %v172_v10  ;;  %v1499_v41 = vld [vmem:[#allocation3 + $0x4] ss:$8 sps:$4 sm:$0xff]   ;;  %v165_v48 = vld [vmem:[#allocation6 + $0x30] sm:$0xff]  ;;  %v166_v50 = vld [vmem:[#allocation6 + $0x38] sm:$0xff] }
  0x2c   :  { %v1371_v22 = vcombine.low %v217_v12, %v218_v17  ;;  %v1372_v26 = vcombine.high %v217_v12, %v218_v17  ;;  %v1369_v38 = vcombine.low %v215_v31, %v216_v32  ;;  %v1370_v39 = vcombine.high %v215_v31, %v216_v32  ;;  %v1502_v42 = vld [vmem:[#allocation3 + $0x84] ss:$8 sps:$4 sm:$0xff]   ;;  %847 = vmatprep.mubr.bf16.mxu0 %v1499_v41  ;;  %v161_v9 = vld [vmem:[#allocation6 + $0x10] sm:$0xff]  ;;  %v162_v10 = vld [vmem:[#allocation6 + $0x18] sm:$0xff] }
  0x2d   :  { %v1440_v23 = vcombine.high %v413_v18, %v414_v19  ;;  %v1439_v24 = vcombine.low %v413_v18, %v414_v19  ;;  %v1438_v25 = vcombine.high %v411_v20, %v412_v21  ;;  %v1437_v33 = vcombine.low %v411_v20, %v412_v21  ;;  %927 = vmatprep.mubr.bf16.mxu1 %v1502_v42  ;;  %v163_v59 = vld [vmem:[#allocation6 + $0x20] sm:$0xff]  ;;  %v164_v62 = vld [vmem:[#allocation6 + $0x28] sm:$0xff]  ;;  %v205_v21 = vld [vmem:[#allocation8 + $0x70] sm:$0xff] }
  0x2e   :  { %v409_v29 = vmul.bf16 %v1371_v22, %v169_v27  ;;  %v410_v30 = vmul.bf16 %v1372_v26, %v170_v28  ;;  %v407_v43 = vmul.bf16 %v1369_v38, %v167_v34  ;;  %v408_v44 = vmul.bf16 %v1370_v39, %v168_v35  ;;  %v191_v63 = vld [vmem:[#allocation8] sm:$0xff]  ;;  %v192_v0 = vld [vmem:[#allocation8 + $0x8] sm:$0xff]  ;;  %v206_v22 = vld [vmem:[#allocation8 + $0x78] sm:$0xff] }
  0x2f   :  { %815 = vmatprep.subr.bf16.mxu0 %v1440_v23  ;;  %1457 = vmatprep.subr.bf16.mxu1 %v1440_v23  ;;  %v213_v45 = vunpack.c.h.s8.bf16 %v193_v36  ;;  %v214_v46 = vunpack.c.h.s8.bf16 %v194_v40  ;;  %v211_v55 = vunpack.c.l.s8.bf16 %v193_v36  ;;  %v212_v56 = vunpack.c.l.s8.bf16 %v194_v40  ;;  %v159_v17 = vld [vmem:[#allocation6] sm:$0xff]  ;;  %v160_v20 = vld [vmem:[#allocation6 + $0x8] sm:$0xff]  ;;  %v189_v31 = vld [vmem:[#allocation6 + $0xf0] sm:$0xff] }
  0x30   :  { %816 = vmatpush1.bf16.xpose.msra.mxu0 %v1439_v24  ;;  %1473 = vmatpush1.bf16.xpose.msra.mxu1 %v1439_v24  ;;  %v1436_v37 = vcombine.high %v409_v29, %v410_v30  ;;  %v1435_v47 = vcombine.low %v409_v29, %v410_v30  ;;  %v1434_v49 = vcombine.high %v407_v43, %v408_v44  ;;  %v209_v3 = vunpack.c.h.s8.bf16 %v191_v63  ;;  %v190_v32 = vld [vmem:[#allocation6 + $0xf8] sm:$0xff]  ;;  %v187_v39 = vld [vmem:[#allocation6 + $0xe0] sm:$0xff]  ;;  %v188_v42 = vld [vmem:[#allocation6 + $0xe8] sm:$0xff] }
  0x31   :  { %817 = vmatprep.subr.bf16.mxu0 %v1438_v25  ;;  %1458 = vmatprep.subr.bf16.mxu1 %v1438_v25  ;;  %v1367_v51 = vcombine.low %v213_v45, %v214_v46  ;;  %v1368_v52 = vcombine.high %v213_v45, %v214_v46  ;;  %v1433_v57 = vcombine.low %v407_v43, %v408_v44  ;;  %v210_v4 = vunpack.c.h.s8.bf16 %v192_v0  ;;  %v203_v43 = vld [vmem:[#allocation8 + $0x60] sm:$0xff]  ;;  %v204_v44 = vld [vmem:[#allocation8 + $0x68] sm:$0xff] }
  0x32   :  { %v1365_v60 = vcombine.low %v211_v55, %v212_v56  ;;  %v1366_v61 = vcombine.high %v211_v55, %v212_v56  ;;  %v207_v13 = vunpack.c.l.s8.bf16 %v191_v63  ;;  %v208_v14 = vunpack.c.l.s8.bf16 %v192_v0  ;;  %v184_v0 = vld [vmem:[#allocation6 + $0xc8] sm:$0xff] }
  0x33   :  { %v405_v53 = vmul.bf16 %v1367_v51, %v165_v48  ;;  %v406_v54 = vmul.bf16 %v1368_v52, %v166_v50  ;;  %v1363_v7 = vcombine.low %v209_v3, %v210_v4  ;;  %v1364_v8 = vcombine.high %v209_v3, %v210_v4 }
  0x34   :  { %v403_v1 = vmul.bf16 %v1365_v60, %v163_v59  ;;  %v404_v2 = vmul.bf16 %v1366_v61, %v164_v62  ;;  %v1361_v18 = vcombine.low %v207_v13, %v208_v14  ;;  %v1362_v19 = vcombine.high %v207_v13, %v208_v14  ;;  %v183_v61 = vld [vmem:[#allocation6 + $0xc0] sm:$0xff] }
  0x35   :  { %v1432_v58 = vcombine.high %v405_v53, %v406_v54  ;;  %v1431_v5 = vcombine.low %v405_v53, %v406_v54  ;;  %v401_v11 = vmul.bf16 %v1363_v7, %v161_v9  ;;  %v402_v12 = vmul.bf16 %v1364_v8, %v162_v10  ;;  %v185_v53 = vld [vmem:[#allocation6 + $0xd0] sm:$0xff]  ;;  %v186_v54 = vld [vmem:[#allocation6 + $0xd8] sm:$0xff] }
  0x36   :  { %v1430_v6 = vcombine.high %v403_v1, %v404_v2  ;;  %v1429_v15 = vcombine.low %v403_v1, %v404_v2  ;;  %v399_v23 = vmul.bf16 %v1361_v18, %v159_v17  ;;  %v400_v24 = vmul.bf16 %v1362_v19, %v160_v20  ;;  %v201_v1 = vld [vmem:[#allocation8 + $0x50] sm:$0xff]  ;;  %v202_v2 = vld [vmem:[#allocation8 + $0x58] sm:$0xff]  ;;  %v179_v19 = vld [vmem:[#allocation6 + $0xa0] sm:$0xff] }
  0x37   :  { %v1428_v16 = vcombine.high %v401_v11, %v402_v12  ;;  %v237_v25 = vunpack.c.h.s8.bf16 %v205_v21  ;;  %v238_v26 = vunpack.c.h.s8.bf16 %v206_v22  ;;  %v1427_v27 = vcombine.low %v401_v11, %v402_v12  ;;  %v181_v11 = vld [vmem:[#allocation6 + $0xb0] sm:$0xff]  ;;  %v182_v12 = vld [vmem:[#allocation6 + $0xb8] sm:$0xff] }
  0x38   :  { %818 = vmatpush1.bf16.xpose.msra.mxu0 %v1437_v33  ;;  %1474 = vmatpush1.bf16.xpose.msra.mxu1 %v1437_v33  ;;  %v1426_v28 = vcombine.high %v399_v23, %v400_v24  ;;  %v235_v35 = vunpack.c.l.s8.bf16 %v205_v21  ;;  %v236_v36 = vunpack.c.l.s8.bf16 %v206_v22  ;;  %v234_v48 = vunpack.c.h.s8.bf16 %v204_v44  ;;  %v180_v22 = vld [vmem:[#allocation6 + $0xa8] sm:$0xff] }
  0x39   :  { %819 = vmatprep.subr.bf16.mxu0 %v1436_v37  ;;  %1459 = vmatprep.subr.bf16.mxu1 %v1436_v37  ;;  %v1391_v29 = vcombine.low %v237_v25, %v238_v26  ;;  %v1392_v30 = vcombine.high %v237_v25, %v238_v26  ;;  %v1425_v37 = vcombine.low %v399_v23, %v400_v24  ;;  %v199_v23 = vld [vmem:[#allocation8 + $0x40] sm:$0xff]  ;;  %v200_v24 = vld [vmem:[#allocation8 + $0x48] sm:$0xff] }
  0x3a   :  { %v1389_v40 = vcombine.low %v235_v35, %v236_v36  ;;  %v1390_v41 = vcombine.high %v235_v35, %v236_v36 }
  0x3b   :  { %v429_v33 = vmul.bf16 %v1391_v29, %v189_v31  ;;  %v430_v34 = vmul.bf16 %v1392_v30, %v190_v32 }
  0x3c   :  { %v427_v45 = vmul.bf16 %v1389_v40, %v187_v39  ;;  %v428_v46 = vmul.bf16 %v1390_v41, %v188_v42 }
  0x3d   :  { %v1456_v38 = vcombine.high %v429_v33, %v430_v34 }
  0x3e   :  { %v1454_v50 = vcombine.high %v427_v45, %v428_v46  ;;  %v1453_v59 = vcombine.low %v427_v45, %v428_v46 }
  0x40   :  { %820 = vmatpush1.bf16.xpose.msra.mxu0 %v1435_v47  ;;  %1475 = vmatpush1.bf16.xpose.msra.mxu1 %v1435_v47  ;;  %v233_v47 = vunpack.c.h.s8.bf16 %v203_v43 }
  0x41   :  { %821 = vmatprep.subr.bf16.mxu0 %v1434_v49  ;;  %1460 = vmatprep.subr.bf16.mxu1 %v1434_v49  ;;  %v1455_v49 = vcombine.low %v429_v33, %v430_v34  ;;  %v177_v33 = vld [vmem:[#allocation6 + $0x90] sm:$0xff]  ;;  %v178_v34 = vld [vmem:[#allocation6 + $0x98] sm:$0xff] }
  0x42   :  { %v1387_v51 = vcombine.low %v233_v47, %v234_v48  ;;  %v1388_v52 = vcombine.high %v233_v47, %v234_v48 }
  0x44   :  { %v425_v55 = vmul.bf16 %v1387_v51, %v185_v53  ;;  %v426_v56 = vmul.bf16 %v1388_v52, %v186_v54  ;;  %v1500_v51 = vld [vmem:[#allocation3 + $0x80] ss:$8 sps:$4 sm:$0xff]   ;;  %v1503_v52 = vld [vmem:[#allocation3 + $0x14] ss:$8 sps:$4 sm:$0xff]   ;;  %v1507_v54 = vld [vmem:[#allocation3 + $0x10] ss:$8 sps:$4 sm:$0xff]  }
  0x45   :  { %v1505_v53 = vld [vmem:[#allocation3 + $0x94] ss:$8 sps:$4 sm:$0xff]  }
  0x46   :  { %v1452_v60 = vcombine.high %v425_v55, %v426_v56  ;;  %v1451_v7 = vcombine.low %v425_v55, %v426_v56  ;;  %v1508_v55 = vld [vmem:[#allocation3 + $0x90] ss:$8 sps:$4 sm:$0xff]   ;;  %v1509_v56 = vld [vmem:[#allocation3 + $0x24] ss:$8 sps:$4 sm:$0xff]  }
  0x48   :  { %822 = vmatpush1.bf16.xpose.msra.mxu0 %v1433_v57  ;;  %1476 = vmatpush1.bf16.xpose.msra.mxu1 %v1433_v57  ;;  %v231_v57 = vunpack.c.l.s8.bf16 %v203_v43  ;;  %v175_v43 = vld [vmem:[#allocation6 + $0x80] sm:$0xff] }
  0x49   :  { %823 = vmatprep.subr.bf16.mxu0 %v1432_v58  ;;  %1461 = vmatprep.subr.bf16.mxu1 %v1432_v58  ;;  %v232_v58 = vunpack.c.l.s8.bf16 %v204_v44  ;;  %v176_v44 = vld [vmem:[#allocation6 + $0x88] sm:$0xff] }
  0x4b   :  { %v1385_v62 = vcombine.low %v231_v57, %v232_v58  ;;  %v1386_v63 = vcombine.high %v231_v57, %v232_v58  ;;  %v1511_v57 = vld [vmem:[#allocation3 + $0xa4] ss:$8 sps:$4 sm:$0xff]   ;;  %v1513_v58 = vld [vmem:[#allocation3 + $0x20] ss:$8 sps:$4 sm:$0xff]  }
  0x4d   :  { %v423_v3 = vmul.bf16 %v1385_v62, %v183_v61  ;;  %v424_v4 = vmul.bf16 %v1386_v63, %v184_v0  ;;  %v1517_v61 = vld [vmem:[#allocation3 + $0xb4] ss:$8 sps:$4 sm:$0xff]   ;;  %v1519_v62 = vld [vmem:[#allocation3 + $0x30] ss:$8 sps:$4 sm:$0xff]   ;;  %v1521_v0 = vld [vmem:[#allocation3 + $0x44] ss:$8 sps:$4 sm:$0xff]  }
  0x4e   :  { %v1520_v63 = vld [vmem:[#allocation3 + $0xb0] ss:$8 sps:$4 sm:$0xff]  }
  0x4f   :  { %v1450_v8 = vcombine.high %v423_v3, %v424_v4  ;;  %v1449_v17 = vcombine.low %v423_v3, %v424_v4  ;;  %v1526_v3 = vld [vmem:[#allocation3 + $0xc0] ss:$8 sps:$4 sm:$0xff]   ;;  %v1527_v4 = vld [vmem:[#allocation3 + $0x54] ss:$8 sps:$4 sm:$0xff]  }
  0x50   :  { %824 = vmatpush1.bf16.xpose.msra.mxu0 %v1431_v5  ;;  %1477 = vmatpush1.bf16.xpose.msra.mxu1 %v1431_v5  ;;  %v229_v5 = vunpack.c.h.s8.bf16 %v201_v1 }
  0x51   :  { %825 = vmatprep.subr.bf16.mxu0 %v1430_v6  ;;  %1462 = vmatprep.subr.bf16.mxu1 %v1430_v6  ;;  %v230_v6 = vunpack.c.h.s8.bf16 %v202_v2 }
  0x53   :  { %v1383_v9 = vcombine.low %v229_v5, %v230_v6  ;;  %v1384_v10 = vcombine.high %v229_v5, %v230_v6  ;;  %v1529_v5 = vld [vmem:[#allocation3 + $0xd4] ss:$8 sps:$4 sm:$0xff]   ;;  %v1531_v6 = vld [vmem:[#allocation3 + $0x50] ss:$8 sps:$4 sm:$0xff]  }
  0x55   :  { %v421_v13 = vmul.bf16 %v1383_v9, %v181_v11  ;;  %v422_v14 = vmul.bf16 %v1384_v10, %v182_v12  ;;  %v1535_v9 = vld [vmem:[#allocation3 + $0xe4] ss:$8 sps:$4 sm:$0xff]   ;;  %v1537_v10 = vld [vmem:[#allocation3 + $0x60] ss:$8 sps:$4 sm:$0xff]   ;;  %v1539_v12 = vld [vmem:[#allocation3 + $0x74] ss:$8 sps:$4 sm:$0xff]  }
  0x56   :  { %v1538_v11 = vld [vmem:[#allocation3 + $0xe0] ss:$8 sps:$4 sm:$0xff]  }
  0x57   :  { %v1448_v18 = vcombine.high %v421_v13, %v422_v14  ;;  %v1447_v29 = vcombine.low %v421_v13, %v422_v14  ;;  %v1541_v13 = vld [vmem:[#allocation3 + $0xf4] ss:$8 sps:$4 sm:$0xff]   ;;  %v1543_v14 = vld [vmem:[#allocation3 + $0x70] ss:$8 sps:$4 sm:$0xff]  }
  0x58   :  { %826 = vmatpush1.bf16.xpose.msra.mxu0 %v1429_v15  ;;  %1478 = vmatpush1.bf16.xpose.msra.mxu1 %v1429_v15  ;;  %v227_v15 = vunpack.c.l.s8.bf16 %v201_v1  ;;  %v1523_v1 = vld [vmem:[#allocation3 + $0xc4] ss:$8 sps:$4 sm:$0xff]  }
  0x59   :  { %827 = vmatprep.subr.bf16.mxu0 %v1428_v16  ;;  %1463 = vmatprep.subr.bf16.mxu1 %v1428_v16  ;;  %v228_v16 = vunpack.c.l.s8.bf16 %v202_v2  ;;  %v1525_v2 = vld [vmem:[#allocation3 + $0x40] ss:$8 sps:$4 sm:$0xff]  }
  0x5b   :  { %v1381_v20 = vcombine.low %v227_v15, %v228_v16  ;;  %v1382_v21 = vcombine.high %v227_v15, %v228_v16  ;;  %v1544_v15 = vld [vmem:[#allocation3 + $0xf0] ss:$8 sps:$4 sm:$0xff]   ;;  %v1205_v16 = vlaneseq }
  0x5d   :  { %v419_v25 = vmul.bf16 %v1381_v20, %v179_v19  ;;  %v420_v26 = vmul.bf16 %v1382_v21, %v180_v22  ;;  %v1203_v19 = vld [vmem:[%s1756_s3] sm:$0x3]  ;;  %s1638_s3 = smov [#allocation9]  }
  0x5e   :  { %s1348_s7 = sshll.u32 %s1638_s3, 4  ;;  %s1349_s7 = int_to_ptr.vmem [resolvable:$true] %s1348_s7 }
  0x5f   :  { %v1446_v30 = vcombine.high %v419_v25, %v420_v26  ;;  %v1445_v39 = vcombine.low %v419_v25, %v420_v26  ;;  %s1605_s8 = scalar_lea.vmem %s1349_s7, 8192  ;;  %p1610_p2 = scmp.lt.s32.totalorder %s1349_s7, %s1349_s7 }
  0x60   :  { %828 = vmatpush1.bf16.xpose.msra.mxu0 %v1427_v27  ;;  %1479 = vmatpush1.bf16.xpose.msra.mxu1 %v1427_v27  ;;  %v225_v27 = vunpack.c.h.s8.bf16 %v199_v23  ;;  %p1606_p1 = scmp.ne.s32.totalorder %s1349_s7, %s1605_s8  ;;  %p1611_p3 = scmp.lt.s32.totalorder %s1605_s8, %s1605_s8 }
  0x61   :  { %829 = vmatprep.subr.bf16.mxu0 %v1426_v28  ;;  %1464 = vmatprep.subr.bf16.mxu1 %v1426_v28  ;;  %v226_v28 = vunpack.c.h.s8.bf16 %v200_v24 }
  0x62   :  { %p1612_p4 = por %p1611_p3, %p1610_p2 }
  0x63   :  { %v1379_v31 = vcombine.low %v225_v27, %v226_v28  ;;  %v1380_v32 = vcombine.high %v225_v27, %v226_v28 }
  0x64   :  { %p1613_p5 = pnand %p1612_p4, %p1606_p1 }
  0x65   :  { %v417_v35 = vmul.bf16 %v1379_v31, %v177_v33  ;;  %v418_v36 = vmul.bf16 %v1380_v32, %v178_v34 }
  0x67   :  { %v1444_v40 = vcombine.high %v417_v35, %v418_v36  ;;  %v1443_v47 = vcombine.low %v417_v35, %v418_v36 }
  0x68   :  { %830 = vmatpush1.bf16.xpose.msra.mxu0 %v1425_v37  ;;  %1480 = vmatpush1.bf16.xpose.msra.mxu1 %v1425_v37  ;;  %v223_v37 = vunpack.c.l.s8.bf16 %v199_v23 }
  0x69   :  { %831 = vmatprep.subr.bf16.mxu0 %v1456_v38  ;;  %1465 = vmatprep.subr.bf16.mxu1 %v1456_v38  ;;  %v224_v38 = vunpack.c.l.s8.bf16 %v200_v24 }
  0x6b   :  { %v1377_v41 = vcombine.low %v223_v37, %v224_v38  ;;  %v1378_v42 = vcombine.high %v223_v37, %v224_v38 }
  0x6d   :  { %v415_v45 = vmul.bf16 %v1377_v41, %v175_v43  ;;  %v416_v46 = vmul.bf16 %v1378_v42, %v176_v44 }
  0x6f   :  { %v1442_v48 = vcombine.high %v415_v45, %v416_v46 }
  0x70   :  { %832 = vmatpush2.bf16.xpose.msra.mxu0 %v1455_v49  ;;  %1481 = vmatpush2.bf16.xpose.msra.mxu1 %v1455_v49  ;;  %v1441_v49 = vcombine.low %v415_v45, %v416_v46 }
  0x71   :  { %833 = vmatprep.subr.bf16.mxu0 %v1454_v50  ;;  %1466 = vmatprep.subr.bf16.mxu1 %v1454_v50  ;;  %v1497_v50 = vld [vmem:[#allocation3] ss:$8 sps:$4 sm:$0xff]  }
  0x78   :  { %834 = vmatpush2.bf16.xpose.msra.mxu0 %v1453_v59  ;;  %1482 = vmatpush2.bf16.xpose.msra.mxu1 %v1453_v59  ;;  %v1514_v59 = vld [vmem:[#allocation3 + $0xa0] ss:$8 sps:$4 sm:$0xff]  }
  0x79   :  { %835 = vmatprep.subr.bf16.mxu0 %v1452_v60  ;;  %1467 = vmatprep.subr.bf16.mxu1 %v1452_v60  ;;  %v1515_v60 = vld [vmem:[#allocation3 + $0x34] ss:$8 sps:$4 sm:$0xff]  }
  0x80   :  { %836 = vmatpush2.bf16.xpose.msra.mxu0 %v1451_v7  ;;  %1483 = vmatpush2.bf16.xpose.msra.mxu1 %v1451_v7  ;;  %v1532_v7 = vld [vmem:[#allocation3 + $0xd0] ss:$8 sps:$4 sm:$0xff]  }
  0x81   :  { %837 = vmatprep.subr.bf16.mxu0 %v1450_v8  ;;  %1468 = vmatprep.subr.bf16.mxu1 %v1450_v8  ;;  %v1533_v8 = vld [vmem:[#allocation3 + $0x64] ss:$8 sps:$4 sm:$0xff]  }
  0x88   :  { %838 = vmatpush2.bf16.xpose.msra.mxu0 %v1449_v17  ;;  %1484 = vmatpush2.bf16.xpose.msra.mxu1 %v1449_v17  ;;  %v1206_v17 = vshrl.u32 %v1205_v16, 7 }
  0x89   :  { %839 = vmatprep.subr.bf16.mxu0 %v1448_v18  ;;  %1469 = vmatprep.subr.bf16.mxu1 %v1448_v18 }
  0x8a   :  { %v1207_v18 = vsub.s32 0, %v1206_v17  ;;  %v1211_v20 = vsub.s32 1, %v1206_v17 }
  0x8c   :  { %v1679_v21 = vrot.slane %v1203_v19, %v1207_v18  ;;  %v1681_v22 = vrot.slane %v1203_v19, %v1211_v20 }
  0x90   :  { %840 = vmatpush2.bf16.xpose.msra.mxu0 %v1447_v29  ;;  %1485 = vmatpush2.bf16.xpose.msra.mxu1 %v1447_v29 }
  0x91   :  { %841 = vmatprep.subr.bf16.mxu0 %v1446_v30  ;;  %1470 = vmatprep.subr.bf16.mxu1 %v1446_v30 }
  0x98   :  { %842 = vmatpush2.bf16.xpose.msra.mxu0 %v1445_v39  ;;  %1486 = vmatpush2.bf16.xpose.msra.mxu1 %v1445_v39 }
  0x99   :  { %843 = vmatprep.subr.bf16.mxu0 %v1444_v40  ;;  %1471 = vmatprep.subr.bf16.mxu1 %v1444_v40 }
  0xa0   :  { %844 = vmatpush2.bf16.xpose.msra.mxu0 %v1443_v47  ;;  %1487 = vmatpush2.bf16.xpose.msra.mxu1 %v1443_v47 }
  0xa1   :  { %845 = vmatprep.subr.bf16.mxu0 %v1442_v48  ;;  %1472 = vmatprep.subr.bf16.mxu1 %v1442_v48 }
  0xa8   :  { %846 = vmatpush2.bf16.xpose.msra.mxu0 %v1441_v49  ;;  %1488 = vmatpush2.bf16.xpose.msra.mxu1 %v1441_v49 }
  0xaf   :  { %848 = vmatmul.mubr.bf16.vlgmr.msra.gmra.mxu0 %v1497_v50  ;;  %928 = vmatmul.mubr.bf16.vlgmr.msra.gmra.mxu1 %v1500_v51 }
  0xb0   :  { %857 = vmatprep.mubr.bf16.mxu0 %v1503_v52  ;;  %937 = vmatprep.mubr.bf16.mxu1 %v1505_v53 }
  0xb7   :  { %858 = vmatmul.mubr.bf16.gmra.mxu0 %v1507_v54  ;;  %938 = vmatmul.mubr.bf16.gmra.mxu1 %v1508_v55 }
  0xb8   :  { %867 = vmatprep.mubr.bf16.mxu0 %v1509_v56  ;;  %947 = vmatprep.mubr.bf16.mxu1 %v1511_v57 }
  0xbf   :  { %868 = vmatmul.mubr.bf16.gmra.mxu0 %v1513_v58  ;;  %948 = vmatmul.mubr.bf16.gmra.mxu1 %v1514_v59 }
  0xc0   :  { %877 = vmatprep.mubr.bf16.mxu0 %v1515_v60  ;;  %957 = vmatprep.mubr.bf16.mxu1 %v1517_v61 }
  0xc7   :  { %878 = vmatmul.mubr.bf16.gmra.mxu0 %v1519_v62  ;;  %958 = vmatmul.mubr.bf16.gmra.mxu1 %v1520_v63 }
  0xc8   :  { %887 = vmatprep.mubr.bf16.mxu0 %v1521_v0  ;;  %967 = vmatprep.mubr.bf16.mxu1 %v1523_v1 }
  0xcf   :  { %888 = vmatmul.mubr.bf16.gmra.mxu0 %v1525_v2  ;;  %968 = vmatmul.mubr.bf16.gmra.mxu1 %v1526_v3 }
  0xd0   :  { %897 = vmatprep.mubr.bf16.mxu0 %v1527_v4  ;;  %977 = vmatprep.mubr.bf16.mxu1 %v1529_v5 }
  0xd7   :  { %898 = vmatmul.mubr.bf16.gmra.mxu0 %v1531_v6  ;;  %978 = vmatmul.mubr.bf16.gmra.mxu1 %v1532_v7 }
  0xd8   :  { %907 = vmatprep.mubr.bf16.mxu0 %v1533_v8  ;;  %987 = vmatprep.mubr.bf16.mxu1 %v1535_v9 }
  0xdf   :  { %908 = vmatmul.mubr.bf16.gmra.mxu0 %v1537_v10  ;;  %988 = vmatmul.mubr.bf16.gmra.mxu1 %v1538_v11 }
  0xe0   :  { %917 = vmatprep.mubr.bf16.mxu0 %v1539_v12  ;;  %997 = vmatprep.mubr.bf16.mxu1 %v1541_v13 }
  0xe7   :  { %918 = vmatmul.mubr.bf16.gmra.mxu0 %v1543_v14  ;;  %998 = vmatmul.mubr.bf16.gmra.mxu1 %v1544_v15 }
 0x16f   :  { %v849_v23 = vpop.f32.mrf.mxu0  ;;  %v929_v24 = vpop.f32.mrf.mxu1 }
 0x170   :  { %v1215_v25 = vadd.f32 %v1679_v21, %v849_v23  ;;  %v1247_v26 = vadd.f32 %v1679_v21, %v929_v24 }
 0x171   :  { %v851_v27 = vpop.f32.mrf.mxu0  ;;  %v931_v28 = vpop.f32.mrf.mxu1 }
 0x172   :  { %1279 = vst [vmem:[#allocation9] sm:$0xff] %v1215_v25  ;;  %1311 = vst [vmem:[#allocation9 + $0x100] sm:$0xff] %v1247_v26  ;;  %v1216_v29 = vadd.f32 %v1681_v22, %v851_v27  ;;  %v1248_v30 = vadd.f32 %v1681_v22, %v931_v28 }
 0x173   :  { %v853_v31 = vpop.f32.mrf.mxu0  ;;  %v933_v32 = vpop.f32.mrf.mxu1 }
 0x174   :  { %1280 = vst [vmem:[#allocation9 + $0x8] sm:$0xff] %v1216_v29  ;;  %1312 = vst [vmem:[#allocation9 + $0x108] sm:$0xff] %v1248_v30  ;;  %v1217_v33 = vadd.f32 %v1679_v21, %v853_v31  ;;  %v1249_v34 = vadd.f32 %v1679_v21, %v933_v32 }
 0x175   :  { %v855_v35 = vpop.f32.mrf.mxu0  ;;  %v935_v36 = vpop.f32.mrf.mxu1 }
 0x176   :  { %1281 = vst [vmem:[#allocation9 + $0x10] sm:$0xff] %v1217_v33  ;;  %1313 = vst [vmem:[#allocation9 + $0x110] sm:$0xff] %v1249_v34  ;;  %v1218_v37 = vadd.f32 %v1681_v22, %v855_v35  ;;  %v1250_v38 = vadd.f32 %v1681_v22, %v935_v36 }
 0x177   :  { %v859_v39 = vpop.f32.mrf.mxu0  ;;  %v939_v40 = vpop.f32.mrf.mxu1 }
 0x178   :  { %1282 = vst [vmem:[#allocation9 + $0x18] sm:$0xff] %v1218_v37  ;;  %1314 = vst [vmem:[#allocation9 + $0x118] sm:$0xff] %v1250_v38  ;;  %v1219_v41 = vadd.f32 %v1679_v21, %v859_v39  ;;  %v1251_v42 = vadd.f32 %v1679_v21, %v939_v40 }
 0x179   :  { %v861_v43 = vpop.f32.mrf.mxu0  ;;  %v941_v44 = vpop.f32.mrf.mxu1 }
 0x17a   :  { %1283 = vst [vmem:[#allocation9 + $0x20] sm:$0xff] %v1219_v41  ;;  %1315 = vst [vmem:[#allocation9 + $0x120] sm:$0xff] %v1251_v42  ;;  %v1220_v45 = vadd.f32 %v1681_v22, %v861_v43  ;;  %v1252_v46 = vadd.f32 %v1681_v22, %v941_v44 }
 0x17b   :  { %v863_v47 = vpop.f32.mrf.mxu0  ;;  %v943_v48 = vpop.f32.mrf.mxu1 }
 0x17c   :  { %1284 = vst [vmem:[#allocation9 + $0x28] sm:$0xff] %v1220_v45  ;;  %1316 = vst [vmem:[#allocation9 + $0x128] sm:$0xff] %v1252_v46  ;;  %v1221_v49 = vadd.f32 %v1679_v21, %v863_v47  ;;  %v1253_v50 = vadd.f32 %v1679_v21, %v943_v48 }
 0x17d   :  { %v865_v51 = vpop.f32.mrf.mxu0  ;;  %v945_v52 = vpop.f32.mrf.mxu1 }
 0x17e   :  { %1285 = vst [vmem:[#allocation9 + $0x30] sm:$0xff] %v1221_v49  ;;  %1317 = vst [vmem:[#allocation9 + $0x130] sm:$0xff] %v1253_v50  ;;  %v1222_v53 = vadd.f32 %v1681_v22, %v865_v51  ;;  %v1254_v54 = vadd.f32 %v1681_v22, %v945_v52 }
 0x17f   :  { %v869_v55 = vpop.f32.mrf.mxu0  ;;  %v949_v56 = vpop.f32.mrf.mxu1 }
 0x180   :  { %1286 = vst [vmem:[#allocation9 + $0x38] sm:$0xff] %v1222_v53  ;;  %1318 = vst [vmem:[#allocation9 + $0x138] sm:$0xff] %v1254_v54  ;;  %v1223_v57 = vadd.f32 %v1679_v21, %v869_v55  ;;  %v1255_v58 = vadd.f32 %v1679_v21, %v949_v56 }
 0x181   :  { %v871_v59 = vpop.f32.mrf.mxu0  ;;  %v951_v60 = vpop.f32.mrf.mxu1 }
 0x182   :  { %1287 = vst [vmem:[#allocation9 + $0x40] sm:$0xff] %v1223_v57  ;;  %1319 = vst [vmem:[#allocation9 + $0x140] sm:$0xff] %v1255_v58  ;;  %v1224_v61 = vadd.f32 %v1681_v22, %v871_v59  ;;  %v1256_v62 = vadd.f32 %v1681_v22, %v951_v60 }
 0x183   :  { %v873_v63 = vpop.f32.mrf.mxu0  ;;  %v953_v0 = vpop.f32.mrf.mxu1 }
 0x184   :  { %1288 = vst [vmem:[#allocation9 + $0x48] sm:$0xff] %v1224_v61  ;;  %1320 = vst [vmem:[#allocation9 + $0x148] sm:$0xff] %v1256_v62  ;;  %v1225_v1 = vadd.f32 %v1679_v21, %v873_v63  ;;  %v1257_v2 = vadd.f32 %v1679_v21, %v953_v0 }
 0x185   :  { %v875_v3 = vpop.f32.mrf.mxu0  ;;  %v955_v4 = vpop.f32.mrf.mxu1 }
 0x186   :  { %1289 = vst [vmem:[#allocation9 + $0x50] sm:$0xff] %v1225_v1  ;;  %1321 = vst [vmem:[#allocation9 + $0x150] sm:$0xff] %v1257_v2  ;;  %v1226_v5 = vadd.f32 %v1681_v22, %v875_v3  ;;  %v1258_v6 = vadd.f32 %v1681_v22, %v955_v4 }
 0x187   :  { %v879_v7 = vpop.f32.mrf.mxu0  ;;  %v959_v8 = vpop.f32.mrf.mxu1 }
 0x188   :  { %1290 = vst [vmem:[#allocation9 + $0x58] sm:$0xff] %v1226_v5  ;;  %1322 = vst [vmem:[#allocation9 + $0x158] sm:$0xff] %v1258_v6  ;;  %v1227_v9 = vadd.f32 %v1679_v21, %v879_v7  ;;  %v1259_v10 = vadd.f32 %v1679_v21, %v959_v8 }
 0x189   :  { %v881_v11 = vpop.f32.mrf.mxu0  ;;  %v961_v12 = vpop.f32.mrf.mxu1 }
 0x18a   :  { %1291 = vst [vmem:[#allocation9 + $0x60] sm:$0xff] %v1227_v9  ;;  %1323 = vst [vmem:[#allocation9 + $0x160] sm:$0xff] %v1259_v10  ;;  %v1228_v13 = vadd.f32 %v1681_v22, %v881_v11  ;;  %v1260_v14 = vadd.f32 %v1681_v22, %v961_v12 }
 0x18b   :  { %v883_v15 = vpop.f32.mrf.mxu0  ;;  %v963_v16 = vpop.f32.mrf.mxu1 }
 0x18c   :  { %1292 = vst [vmem:[#allocation9 + $0x68] sm:$0xff] %v1228_v13  ;;  %1324 = vst [vmem:[#allocation9 + $0x168] sm:$0xff] %v1260_v14  ;;  %v1229_v17 = vadd.f32 %v1679_v21, %v883_v15  ;;  %v1261_v18 = vadd.f32 %v1679_v21, %v963_v16 }
 0x18d   :  { %v885_v19 = vpop.f32.mrf.mxu0  ;;  %v965_v20 = vpop.f32.mrf.mxu1 }
 0x18e   :  { %1293 = vst [vmem:[#allocation9 + $0x70] sm:$0xff] %v1229_v17  ;;  %1325 = vst [vmem:[#allocation9 + $0x170] sm:$0xff] %v1261_v18  ;;  %v1230_v23 = vadd.f32 %v1681_v22, %v885_v19  ;;  %v1262_v24 = vadd.f32 %v1681_v22, %v965_v20 }
 0x18f   :  { %v889_v25 = vpop.f32.mrf.mxu0  ;;  %v969_v26 = vpop.f32.mrf.mxu1 }
 0x190   :  { %1294 = vst [vmem:[#allocation9 + $0x78] sm:$0xff] %v1230_v23  ;;  %1326 = vst [vmem:[#allocation9 + $0x178] sm:$0xff] %v1262_v24  ;;  %v1231_v27 = vadd.f32 %v1679_v21, %v889_v25  ;;  %v1263_v28 = vadd.f32 %v1679_v21, %v969_v26 }
 0x191   :  { %v891_v29 = vpop.f32.mrf.mxu0  ;;  %v971_v30 = vpop.f32.mrf.mxu1 }
 0x192   :  { %1295 = vst [vmem:[#allocation9 + $0x80] sm:$0xff] %v1231_v27  ;;  %1327 = vst [vmem:[#allocation9 + $0x180] sm:$0xff] %v1263_v28  ;;  %v1232_v31 = vadd.f32 %v1681_v22, %v891_v29  ;;  %v1264_v32 = vadd.f32 %v1681_v22, %v971_v30 }
 0x193   :  { %v893_v33 = vpop.f32.mrf.mxu0  ;;  %v973_v34 = vpop.f32.mrf.mxu1 }
 0x194   :  { %1296 = vst [vmem:[#allocation9 + $0x88] sm:$0xff] %v1232_v31  ;;  %1328 = vst [vmem:[#allocation9 + $0x188] sm:$0xff] %v1264_v32  ;;  %v1233_v35 = vadd.f32 %v1679_v21, %v893_v33  ;;  %v1265_v36 = vadd.f32 %v1679_v21, %v973_v34 }
 0x195   :  { %v895_v37 = vpop.f32.mrf.mxu0  ;;  %v975_v38 = vpop.f32.mrf.mxu1 }
 0x196   :  { %1297 = vst [vmem:[#allocation9 + $0x90] sm:$0xff] %v1233_v35  ;;  %1329 = vst [vmem:[#allocation9 + $0x190] sm:$0xff] %v1265_v36  ;;  %v1234_v39 = vadd.f32 %v1681_v22, %v895_v37  ;;  %v1266_v40 = vadd.f32 %v1681_v22, %v975_v38 }
 0x197   :  { %v899_v41 = vpop.f32.mrf.mxu0  ;;  %v979_v42 = vpop.f32.mrf.mxu1 }
 0x198   :  { %1298 = vst [vmem:[#allocation9 + $0x98] sm:$0xff] %v1234_v39  ;;  %1330 = vst [vmem:[#allocation9 + $0x198] sm:$0xff] %v1266_v40  ;;  %v1235_v43 = vadd.f32 %v1679_v21, %v899_v41  ;;  %v1267_v44 = vadd.f32 %v1679_v21, %v979_v42 }
 0x199   :  { %v901_v45 = vpop.f32.mrf.mxu0  ;;  %v981_v46 = vpop.f32.mrf.mxu1 }
 0x19a   :  { %1299 = vst [vmem:[#allocation9 + $0xa0] sm:$0xff] %v1235_v43  ;;  %1331 = vst [vmem:[#allocation9 + $0x1a0] sm:$0xff] %v1267_v44  ;;  %v1236_v47 = vadd.f32 %v1681_v22, %v901_v45  ;;  %v1268_v48 = vadd.f32 %v1681_v22, %v981_v46 }
 0x19b   :  { %v903_v49 = vpop.f32.mrf.mxu0  ;;  %v983_v50 = vpop.f32.mrf.mxu1 }
 0x19c   :  { %1300 = vst [vmem:[#allocation9 + $0xa8] sm:$0xff] %v1236_v47  ;;  %1332 = vst [vmem:[#allocation9 + $0x1a8] sm:$0xff] %v1268_v48  ;;  %v1237_v51 = vadd.f32 %v1679_v21, %v903_v49  ;;  %v1269_v52 = vadd.f32 %v1679_v21, %v983_v50 }
 0x19d   :  { %v905_v53 = vpop.f32.mrf.mxu0  ;;  %v985_v54 = vpop.f32.mrf.mxu1 }
 0x19e   :  { %1301 = vst [vmem:[#allocation9 + $0xb0] sm:$0xff] %v1237_v51  ;;  %1333 = vst [vmem:[#allocation9 + $0x1b0] sm:$0xff] %v1269_v52  ;;  %v1238_v55 = vadd.f32 %v1681_v22, %v905_v53  ;;  %v1270_v56 = vadd.f32 %v1681_v22, %v985_v54 }
 0x19f   :  { %v909_v57 = vpop.f32.mrf.mxu0  ;;  %v989_v58 = vpop.f32.mrf.mxu1 }
 0x1a0   :  { %1302 = vst [vmem:[#allocation9 + $0xb8] sm:$0xff] %v1238_v55  ;;  %1334 = vst [vmem:[#allocation9 + $0x1b8] sm:$0xff] %v1270_v56  ;;  %v1239_v59 = vadd.f32 %v1679_v21, %v909_v57  ;;  %v1271_v60 = vadd.f32 %v1679_v21, %v989_v58 }
 0x1a1   :  { %v911_v61 = vpop.f32.mrf.mxu0  ;;  %v991_v62 = vpop.f32.mrf.mxu1 }
 0x1a2   :  { %1303 = vst [vmem:[#allocation9 + $0xc0] sm:$0xff] %v1239_v59  ;;  %1335 = vst [vmem:[#allocation9 + $0x1c0] sm:$0xff] %v1271_v60  ;;  %v1240_v63 = vadd.f32 %v1681_v22, %v911_v61  ;;  %v1272_v0 = vadd.f32 %v1681_v22, %v991_v62 }
 0x1a3   :  { %v913_v1 = vpop.f32.mrf.mxu0  ;;  %v993_v2 = vpop.f32.mrf.mxu1 }
 0x1a4   :  { %1304 = vst [vmem:[#allocation9 + $0xc8] sm:$0xff] %v1240_v63  ;;  %1336 = vst [vmem:[#allocation9 + $0x1c8] sm:$0xff] %v1272_v0  ;;  %v1241_v3 = vadd.f32 %v1679_v21, %v913_v1  ;;  %v1273_v4 = vadd.f32 %v1679_v21, %v993_v2 }
 0x1a5   :  { %v915_v5 = vpop.f32.mrf.mxu0  ;;  %v995_v6 = vpop.f32.mrf.mxu1 }
 0x1a6   :  { %1305 = vst [vmem:[#allocation9 + $0xd0] sm:$0xff] %v1241_v3  ;;  %1337 = vst [vmem:[#allocation9 + $0x1d0] sm:$0xff] %v1273_v4  ;;  %v1242_v7 = vadd.f32 %v1681_v22, %v915_v5  ;;  %v1274_v8 = vadd.f32 %v1681_v22, %v995_v6 }
 0x1a7   :  { %v919_v9 = vpop.f32.mrf.mxu0  ;;  %v999_v10 = vpop.f32.mrf.mxu1 }
 0x1a8   :  { %1306 = vst [vmem:[#allocation9 + $0xd8] sm:$0xff] %v1242_v7  ;;  %1338 = vst [vmem:[#allocation9 + $0x1d8] sm:$0xff] %v1274_v8  ;;  %v1243_v11 = vadd.f32 %v1679_v21, %v919_v9  ;;  %v1275_v12 = vadd.f32 %v1679_v21, %v999_v10 }
 0x1a9   :  { %v921_v13 = vpop.f32.mrf.mxu0  ;;  %v1001_v14 = vpop.f32.mrf.mxu1 }
 0x1aa   :  { %1307 = vst [vmem:[#allocation9 + $0xe0] sm:$0xff] %v1243_v11  ;;  %1339 = vst [vmem:[#allocation9 + $0x1e0] sm:$0xff] %v1275_v12  ;;  %v1244_v15 = vadd.f32 %v1681_v22, %v921_v13  ;;  %v1276_v16 = vadd.f32 %v1681_v22, %v1001_v14 }
 0x1ab   :  { %v923_v17 = vpop.f32.mrf.mxu0  ;;  %v1003_v18 = vpop.f32.mrf.mxu1 }
 0x1ac   :  { %1308 = vst [vmem:[#allocation9 + $0xe8] sm:$0xff] %v1244_v15  ;;  %1340 = vst [vmem:[#allocation9 + $0x1e8] sm:$0xff] %v1276_v16  ;;  %v1245_v19 = vadd.f32 %v1679_v21, %v923_v17  ;;  %v1277_v20 = vadd.f32 %v1679_v21, %v1003_v18 }
 0x1ad   :  { %v925_v23 = vpop.f32.mrf.mxu0  ;;  %v1005_v24 = vpop.f32.mrf.mxu1 }
 0x1ae   :  { %1309 = vst [vmem:[#allocation9 + $0xf0] sm:$0xff] %v1245_v19  ;;  %1341 = vst [vmem:[#allocation9 + $0x1f0] sm:$0xff] %v1277_v20  ;;  %v1246_v25 = vadd.f32 %v1681_v22, %v925_v23  ;;  %v1278_v26 = vadd.f32 %v1681_v22, %v1005_v24 }
 0x1b0   :  { %1310 = vst [vmem:[#allocation9 + $0xf8] sm:$0xff] %v1246_v25  ;;  %1342 = vst [vmem:[#allocation9 + $0x1f8] sm:$0xff] %v1278_v26 }
 0x1b1   :  { %1616 = shalt.err (!%p1613_p5)
}
 0x1b2   :  { %1354 = dma.vmem_to_hbm [thread:$0]  %s1349_s7, 8192, %s1757_s4, [#allocation5], %s1636_s1, %s1636_s1, %s1637_s30  }
 0x1b3   :  { %1629 = dma.done.wait [#allocation5], 8192  }
 0x1b4   :  { %1630 = vsyncadd [#allocation5], 4294959104 }
 0x1b5   :  { %1358 = vsyncpa [#allocation4], 1 }
 0x1b6   :  { %1359 = vsyncpa [#allocation7], 1 }
 0x1b7   :  { %1360 = vsyncpa [#allocation5], 1 }

</bundles_post_ra>
